<compile_context>
chip_gen: v6e
topology: v6e:2x2x1
jax: 0.10.0
libtpu: 0.0.40
codegen_flags: <defaults>
</compile_context>

<pallas_src>
import jax
import jax.numpy as jnp
from jax.experimental import pallas as pl
from jax.experimental.pallas import tpu as pltpu


def _plan_chunks(N: int, DE: int, dtype, *, max_chunks: int = 4,
                 min_chunk_bytes: int = 1 << 20):
    """Statically split the N rows into <= max_chunks contiguous chunks.

    Chunks are kept >= ~1 MiB each (unless the whole array is smaller) so a
    handful of large DMA descriptors saturates HBM bandwidth; awkward N just
    yields one slightly smaller final chunk (no divisibility requirement).
    """
    itemsize = jnp.dtype(dtype).itemsize
    total_bytes = N * DE * itemsize
    n_chunks = max(1, min(max_chunks, N, total_bytes // min_chunk_bytes))
    rows_per_chunk = -(-N // n_chunks)  # ceil-div
    chunks = []
    start = 0
    while start < N:
        rows = min(rows_per_chunk, N - start)
        chunks.append((start, rows))
        start += rows
    return chunks


def _make_dma_copy_kernel(chunks):
    """HBM->HBM copy: start all chunk DMAs, then wait on all of them."""

    def kernel(x_ref, o_ref, sem):
        # x_ref, o_ref: (N, DE) refs in memory_space=pl.ANY (typically HBM).
        copies = []
        for i, (start, rows) in enumerate(chunks):
            cp = pltpu.make_async_copy(
                x_ref.at[pl.ds(start, rows), :],
                o_ref.at[pl.ds(start, rows), :],
                sem.at[i],
            )
            cp.start()
            copies.append(cp)
        for cp in copies:
            cp.wait()

    return kernel


def reshape_to_nested(x: jax.Array, D: int, *, materialize: bool = False) -> jax.Array:
    """Pallas equivalent of ReshapeToNested(D).forward(x).

    x: shape (1, N, D*E). Returns shape (N, D, E), same dtype.

    materialize=False (default, recommended): zero-cost metadata reshape.
    materialize=True: force a physical copy via a direct HBM->HBM DMA kernel.
    """
    assert x.ndim == 3 and x.shape[0] == 1, "expected input of shape (1, N, D*E)"
    _, N, DE = x.shape
    assert DE % D == 0, "last dim must be divisible by D"
    E = DE // D

    if not materialize:
        # Contiguous reshape: metadata-only, no HBM traffic. Best on all gens.
        return jnp.reshape(x, (N, D, E))

    # --- Materialized copy path: direct HBM->HBM DMA, no VMEM round trip. ---
    itemsize = jnp.dtype(x.dtype).itemsize
    chunks = _plan_chunks(N, DE, x.dtype)

    # Free, metadata-only squeeze of the leading size-1 batch dim.
    x_flat = jnp.reshape(x, (N, DE))

    flat = pl.pallas_call(
        _make_dma_copy_kernel(chunks),
        out_shape=jax.ShapeDtypeStruct((N, DE), x.dtype),
        in_specs=[pl.BlockSpec(memory_space=pl.ANY)],
        out_specs=pl.BlockSpec(memory_space=pl.ANY),
        scratch_shapes=[pltpu.SemaphoreType.DMA((len(chunks),))],
        cost_estimate=pl.CostEstimate(
            flops=0,
            transcendentals=0,
            bytes_accessed=2 * N * DE * itemsize,
        ),
    )(x_flat)

    # Free, metadata-only split of the lane axis: (N, D*E) -> (N, D, E).
    return jnp.reshape(flat, (N, D, E))


if __name__ == "__main__":
    # Small shapes consistent with the module: N=8 rows, D=4 nested groups,
    # E=128 features per group  =>  input (1, 8, 512), output (8, 4, 128).
    N, D, E = 8, 4, 128
    key = jax.random.PRNGKey(0)
    x = jax.random.normal(key, (1, N, D * E), dtype=jnp.float32)

    ref = jnp.reshape(x, (N, D, E))

    # Exercise the Pallas DMA-copy kernel once.
    out_kernel = reshape_to_nested(x, D, materialize=True)
    out_kernel = jax.block_until_ready(out_kernel)
    assert out_kernel.shape == (N, D, E)
    assert out_kernel.dtype == x.dtype
    assert jnp.array_equal(out_kernel, ref)

    # Default (recommended) path: zero-cost metadata reshape.
    out_free = jax.block_until_ready(reshape_to_nested(x, D))
    assert jnp.array_equal(out_free, ref)

    print("KERNEL_OK")
</pallas_src>

<mosaic_0001>
module attributes {stable_mosaic.version = 11 : i64} {
  func.func @kernel(%arg0: memref<8x512xf32, #tpu.memory_space<any>>, %arg1: memref<8x512xf32, #tpu.memory_space<any>>, %arg2: memref<1x!tpu.dma_semaphore, #tpu.memory_space<semaphore_mem>>) attributes {dimension_semantics = [], scalar_prefetch = 0 : i64, scratch_operands = 1 : i64, tpu.core_type = #tpu.core_type<tc>} {
    %c0_i32 = arith.constant 0 : i32
    %c0_i32_0 = arith.constant 0 : i32
    %c0_i32_1 = arith.constant 0 : i32
    %0 = tpu.memref_slice %arg0[%c0_i32_0, %c0_i32_1] : memref<8x512xf32, #tpu.memory_space<any>> -> memref<8x512xf32, #tpu.memory_space<any>>
    %c0_i32_2 = arith.constant 0 : i32
    %c0_i32_3 = arith.constant 0 : i32
    %1 = tpu.memref_slice %arg1[%c0_i32_2, %c0_i32_3] : memref<8x512xf32, #tpu.memory_space<any>> -> memref<8x512xf32, #tpu.memory_space<any>>
    %2 = tpu.memref_slice %arg2[%c0_i32] : memref<1x!tpu.dma_semaphore, #tpu.memory_space<semaphore_mem>> -> memref<1x!tpu.dma_semaphore, #tpu.memory_space<semaphore_mem>>
    %3 = tpu.memref_squeeze %2 : memref<1x!tpu.dma_semaphore, #tpu.memory_space<semaphore_mem>> -> memref<!tpu.dma_semaphore, #tpu.memory_space<semaphore_mem>>
    tpu.enqueue_dma source(%0 : memref<8x512xf32, #tpu.memory_space<any>>) target(%1 : memref<8x512xf32, #tpu.memory_space<any>>) target_semaphore(%3 : memref<!tpu.dma_semaphore, #tpu.memory_space<semaphore_mem>>)
    %c0_i32_4 = arith.constant 0 : i32
    %c0_i32_5 = arith.constant 0 : i32
    %c0_i32_6 = arith.constant 0 : i32
    %4 = tpu.memref_slice %arg0[%c0_i32_5, %c0_i32_6] : memref<8x512xf32, #tpu.memory_space<any>> -> memref<8x512xf32, #tpu.memory_space<any>>
    %c0_i32_7 = arith.constant 0 : i32
    %c0_i32_8 = arith.constant 0 : i32
    %5 = tpu.memref_slice %arg1[%c0_i32_7, %c0_i32_8] : memref<8x512xf32, #tpu.memory_space<any>> -> memref<8x512xf32, #tpu.memory_space<any>>
    %6 = tpu.memref_slice %arg2[%c0_i32_4] : memref<1x!tpu.dma_semaphore, #tpu.memory_space<semaphore_mem>> -> memref<1x!tpu.dma_semaphore, #tpu.memory_space<semaphore_mem>>
    %7 = tpu.memref_squeeze %6 : memref<1x!tpu.dma_semaphore, #tpu.memory_space<semaphore_mem>> -> memref<!tpu.dma_semaphore, #tpu.memory_space<semaphore_mem>>
    tpu.wait_dma2 semaphore(%7 : memref<!tpu.dma_semaphore, #tpu.memory_space<semaphore_mem>>) src(%4 : memref<8x512xf32, #tpu.memory_space<any>>) dst(%5 : memref<8x512xf32, #tpu.memory_space<any>>)
    return
  }
}

</mosaic_0001>

<bundles_post_ra>
// kernel: tpu_custom_call.1
= control target key start
LH: loop header
LB: loop body
LE: loop exit
PB: predicated region body
PF: predicated region fallthrough
CT: control target
= control target key end

     0   :  { %s29_s6 = smov [#allocation2]   ;;  %s30_s7 = smov 131072   ;;  %s48_s0 = inlined_call_operand.hbm [shape: f32[8,512], index: 0, kind: input, shape index: {}]   ;;  %s49_s1 = inlined_call_operand.hbm [shape: f32[8,512], index: 1, kind: output, shape index: {}]  }
   0x1   :  { %s31_s8 = smov 0  }
   0x2   :  { %12 = dma.general %s48_s0, 512, %s49_s1, %s29_s6, %s30_s7, [#allocation4], %s31_s8, 0  }
   0x3   :  { %27 = dma.done.wait [#allocation2], 512 }
   0x4   :  { %28 = vsyncadd [#allocation2], 4294966784 }
   0x5   :  { %17 = vsyncmov [#allocation2] }
   0x8   :  { %s18_s13 = vpop.sfrf %17 }
   0x9   :  { %p23_p0 = scmp.ne.s32.totalorder %s18_s13, 0 }
   0xb   :  { %22 = shalt.err (%p23_p0)  }

</bundles_post_ra>
